<compile_context>
chip_gen: v7x
topology: tpu7x:2x2x1
jax: 0.10.0
libtpu: 0.0.40
codegen_flags: <defaults>
</compile_context>

<pallas_src>
import functools
import math

import jax
import jax.numpy as jnp
from jax.experimental import pallas as pl
from jax.experimental.pallas import tpu as pltpu

# --- module hyper-parameters (defaults of the PyTorch module) -----------------
D_MODEL = 32
NUM_HEADS = 4
D_HEAD = D_MODEL // NUM_HEADS
LN_EPS = 1e-5               # torch.nn.LayerNorm default eps
WIDTHMULT = 1.0
INIT_SCALE = 1.0
DEPTHMULT = 1.0
USE_FORWARD_PASS_ROOTL = False
QKNORM = True               # noqknorm=False, affinetransformations=False

NEG_BIG = -1e30             # additive mask for cross-batch score entries


def _layernorm_lastdim(x):
    """Reference-only LayerNorm over the last dim, no affine."""
    mean = jnp.mean(x, axis=-1, keepdims=True)
    var = jnp.mean((x - mean) ** 2, axis=-1, keepdims=True)
    return (x - mean) * jax.lax.rsqrt(var + LN_EPS)


# ------------------------------------------------------------------------------
# Kernel
# ------------------------------------------------------------------------------
def _mha_kernel(x_ref, wqkv_ref, bqkv_ref, wo_ref, bo_ref,
                mavg_ref, bias_ref, d2l_ref, o_ref, *,
                d_model, num_heads):
    f32 = jnp.float32
    dh = d_model // num_heads

    x = x_ref[...]                                            # (B*S, D)

    # --- fused QKV projection: one (B*S, D) x (D, 3D) matmul -------------------
    qkv = jnp.dot(x, wqkv_ref[...], preferred_element_type=f32) + bqkv_ref[...]
    qk = qkv[:, : 2 * d_model]                                # q|k lanes (B*S, 2D)
    v = qkv[:, 2 * d_model:]                                  # (B*S, D)

    # --- per-head LayerNorm on q and k, fused; MXU-based reductions ------------
    if QKNORM:
        m_avg = mavg_ref[...]                                 # (2D, 2D) per-head 1/dh blocks
        mean = jnp.dot(qk, m_avg, preferred_element_type=f32)
        c = qk - mean
        var = jnp.dot(c * c, m_avg, preferred_element_type=f32)
        qk_n = c * jax.lax.rsqrt(var + LN_EPS)
    else:
        qk_n = qk

    q_n = qk_n[:, :d_model] * (1.0 / math.sqrt(dh))           # fold 1/sqrt(d_head)
    k_n = qk_n[:, d_model:]

    # --- head-stacked attention -------------------------------------------------
    # d2l[h*rows + c, d] = 1 iff lane d belongs to head h. It serves both as the
    # head mask for the sublane-stacked k/v copies and as the per-(row,head)
    # softmax-denominator matrix (result broadcast to the head's output lanes).
    d2l = d2l_ref[...]                                        # (H*B*S, D)
    k_stack = jnp.concatenate([k_n] * num_heads, axis=0) * d2l
    v_stack = jnp.concatenate([v] * num_heads, axis=0) * d2l

    # all-head scores (B*S, H*B*S); q-side mask unnecessary (k_stack is masked)
    s = jax.lax.dot_general(q_n, k_stack,
                            dimension_numbers=(((1,), (1,)), ((), ())),
                            preferred_element_type=f32)
    s = s + bias_ref[...]                                     # cross-batch -> -1e30
    if not QKNORM:
        # Unbounded logits: global row max is softmax-invariant per head block.
        s = s - jnp.max(s, axis=-1, keepdims=True)
    p = jnp.exp(s)                                            # masked entries -> 0

    # Unnormalized per-head outputs land directly in their own lanes (v_stack is
    # masked), then one rescale by the per-head softmax denominator.
    acc = jnp.dot(p, v_stack, preferred_element_type=f32)     # (B*S, D)
    denom = jnp.dot(p, d2l, preferred_element_type=f32)       # (B*S, D)
    attn = acc * pl.reciprocal(denom, approx=True)

    # --- output projection -------------------------------------------------------
    out = jnp.dot(attn, wo_ref[...], preferred_element_type=f32) + bo_ref[...]
    o_ref[...] = out.astype(o_ref.dtype)


# ------------------------------------------------------------------------------
# Wrapper
# ------------------------------------------------------------------------------
@jax.jit
def mha_forward(x, w_qkv, b_qkv, w_out, b_out, m_avg, bias_all, d2l):
    """x: (B, S, D). All other args are pre-packed ONCE (outside this jit)."""
    B, S, D = x.shape
    rows = B * S
    x2d = x.reshape(rows, D)                                  # whole batch in one tile

    kernel = functools.partial(_mha_kernel, d_model=D, num_heads=NUM_HEADS)
    out2d = pl.pallas_call(
        kernel,
        out_shape=jax.ShapeDtypeStruct((rows, D), x.dtype),
        grid=(1,),                                            # single invocation
        in_specs=[
            pl.BlockSpec((rows, D), lambda i: (0, 0)),                  # x (flattened)
            pl.BlockSpec((D, 3 * D), lambda i: (0, 0)),                 # wq|wk|wv
            pl.BlockSpec((1, 3 * D), lambda i: (0, 0)),                 # bq|bk|bv
            pl.BlockSpec((D, D), lambda i: (0, 0)),                     # w_out
            pl.BlockSpec((1, D), lambda i: (0, 0)),                     # b_out
            pl.BlockSpec((2 * D, 2 * D), lambda i: (0, 0)),             # LN averaging matrix
            pl.BlockSpec((rows, NUM_HEADS * rows), lambda i: (0, 0)),   # cross-batch bias
            pl.BlockSpec((NUM_HEADS * rows, D), lambda i: (0, 0)),      # head-lane selector
        ],
        out_specs=pl.BlockSpec((rows, D), lambda i: (0, 0)),
        compiler_params=pltpu.CompilerParams(
            dimension_semantics=("arbitrary",)),
    )(x2d, w_qkv, b_qkv, w_out, b_out, m_avg, bias_all, d2l)
    return out2d.reshape(B, S, D)


def pack_params(params):
    """One-time packing of torch-layout params for the fused kernel."""
    wq, bq, wk, bk, wv, bv, wo, bo = params
    w_qkv = jnp.concatenate([wq, wk, wv], axis=1)             # (D, 3D), y = x @ W
    b_qkv = jnp.concatenate([bq, bk, bv], axis=1)             # (1, 3D)
    return w_qkv, b_qkv, wo, bo


def make_constants(B, S, d_model=D_MODEL, num_heads=NUM_HEADS):
    """One-time constant matrices consumed by the kernel."""
    rows = B * S
    dh = d_model // num_heads
    # Per-head block averaging matrix over the concatenated q|k lanes (2D wide).
    g = jnp.arange(2 * d_model) // dh
    m_avg = (g[:, None] == g[None, :]).astype(jnp.float32) / dh          # (2D, 2D)
    # Additive bias keeping batch elements independent, tiled over head blocks.
    rb = jnp.arange(rows) // S
    batch_bias = jnp.where(rb[:, None] == rb[None, :], 0.0, NEG_BIG)
    bias_all = jnp.tile(batch_bias.astype(jnp.float32), (1, num_heads))  # (rows, H*rows)
    # Head-lane selector: [h*rows + c, d] = 1 iff lane d belongs to head h.
    row_head = jnp.arange(num_heads * rows) // rows
    lane_head = jnp.arange(d_model) // dh
    d2l = (row_head[:, None] == lane_head[None, :]).astype(jnp.float32)  # (H*rows, D)
    return m_avg, bias_all, d2l


# ------------------------------------------------------------------------------
# Pure-JAX reference and init (mirrors the PyTorch module exactly)
# ------------------------------------------------------------------------------
def mha_reference(x, params):
    wq, bq, wk, bk, wv, bv, wo, bo = params
    B, S, D = x.shape
    q = x @ wq + bq
    k = x @ wk + bk
    v = x @ wv + bv
    q = q.reshape(B, S, NUM_HEADS, D_HEAD)
    k = k.reshape(B, S, NUM_HEADS, D_HEAD)
    v = v.reshape(B, S, NUM_HEADS, D_HEAD)
    if QKNORM:
        q = _layernorm_lastdim(q)
        k = _layernorm_lastdim(k)
    q = q.transpose(0, 2, 1, 3)
    k = k.transpose(0, 2, 1, 3)
    v = v.transpose(0, 2, 1, 3)
    scores = jnp.einsum("bhqd,bhkd->bhqk", q, k) / math.sqrt(D_HEAD)
    attn = jax.nn.softmax(scores, axis=-1)
    out = jnp.einsum("bhqk,bhkd->bhqd", attn, v)
    out = out.transpose(0, 2, 1, 3).reshape(B, S, D)
    return out @ wo + bo


def init_params(key):
    """Deterministic init mirroring the PyTorch __init__ (default args)."""
    kq, kk, kv, ko = jax.random.split(key, 4)
    std = 1.0 / math.sqrt(D_MODEL)   # kaiming_normal_(fan_in, linear)

    def make_w(k, extra_scale=1.0):
        w_out_in = jax.random.normal(k, (D_MODEL, D_MODEL), jnp.float32) * std
        return (w_out_in * extra_scale).T          # pass (in, out) layout

    out_scale = (1.0 / math.sqrt(WIDTHMULT)) * INIT_SCALE
    if not USE_FORWARD_PASS_ROOTL:
        out_scale *= 1.0 / math.sqrt(DEPTHMULT)
    qk_scale = INIT_SCALE if QKNORM else 1.0

    wq = make_w(kq, qk_scale)
    wk = make_w(kk, qk_scale)
    wv = make_w(kv, INIT_SCALE)
    wo = make_w(ko, out_scale)
    zb = jnp.zeros((1, D_MODEL), jnp.float32)       # biases initialized to zero
    return (wq, zb, wk, zb, wv, zb, wo, zb)


if __name__ == "__main__":
    key = jax.random.PRNGKey(0)
    kx, kp = jax.random.split(key)
    B, S = 2, 8
    x = jax.random.normal(kx, (B, S, D_MODEL), jnp.float32)

    params = init_params(kp)
    packed = pack_params(params)        # ONCE, outside the jitted forward
    consts = make_constants(B, S)       # ONCE

    out = jax.block_until_ready(mha_forward(x, *packed, *consts))
    ref = mha_reference(x, params)

    assert out.shape == (B, S, D_MODEL)
    # Tolerance covers approx EUP reciprocal + MXU-based LayerNorm reduction
    # reassociation (matmul operands remain f32 with f32 accumulation).
    assert jnp.allclose(out, ref, atol=1e-2, rtol=1e-3), "kernel != reference"

    # TODO(synk): optional attention `mask` argument (mask=None path implemented).
    print("KERNEL_OK")
</pallas_src>

<mosaic_0001>
module attributes {stable_mosaic.version = 11 : i64} {
  func.func @_mha_kernel(%arg0: i32, %arg1: memref<16x32xf32, #tpu.memory_space<vmem>>, %arg2: memref<32x96xf32, #tpu.memory_space<vmem>>, %arg3: memref<1x96xf32, #tpu.memory_space<vmem>>, %arg4: memref<32x32xf32, #tpu.memory_space<vmem>>, %arg5: memref<1x32xf32, #tpu.memory_space<vmem>>, %arg6: memref<64x64xf32, #tpu.memory_space<vmem>>, %arg7: memref<16x64xf32, #tpu.memory_space<vmem>>, %arg8: memref<64x32xf32, #tpu.memory_space<vmem>>, %arg9: memref<16x32xf32, #tpu.memory_space<vmem>>) attributes {dimension_semantics = [#tpu.dimension_semantics<arbitrary>], iteration_bounds = array<i64: 1>, scalar_prefetch = 0 : i64, scratch_operands = 0 : i64, tpu.core_type = #tpu.core_type<tc>, window_params = [{pipeline_mode = #tpu.pipeline_mode<synchronous>, transform_indices = @transform_0, window_bounds = array<i64: 16, 32>}, {pipeline_mode = #tpu.pipeline_mode<synchronous>, transform_indices = @transform_1, window_bounds = array<i64: 32, 96>}, {pipeline_mode = #tpu.pipeline_mode<synchronous>, transform_indices = @transform_2, window_bounds = array<i64: 1, 96>}, {pipeline_mode = #tpu.pipeline_mode<synchronous>, transform_indices = @transform_3, window_bounds = array<i64: 32, 32>}, {pipeline_mode = #tpu.pipeline_mode<synchronous>, transform_indices = @transform_4, window_bounds = array<i64: 1, 32>}, {pipeline_mode = #tpu.pipeline_mode<synchronous>, transform_indices = @transform_5, window_bounds = array<i64: 64, 64>}, {pipeline_mode = #tpu.pipeline_mode<synchronous>, transform_indices = @transform_6, window_bounds = array<i64: 16, 64>}, {pipeline_mode = #tpu.pipeline_mode<synchronous>, transform_indices = @transform_7, window_bounds = array<i64: 64, 32>}, {pipeline_mode = #tpu.pipeline_mode<synchronous>, transform_indices = @transform_8, window_bounds = array<i64: 16, 32>}]} {
    %c0 = arith.constant 0 : index
    %c0_0 = arith.constant 0 : index
    %0 = vector.load %arg1[%c0, %c0_0] : memref<16x32xf32, #tpu.memory_space<vmem>>, vector<16x32xf32>
    %c0_1 = arith.constant 0 : index
    %c0_2 = arith.constant 0 : index
    %1 = vector.load %arg2[%c0_1, %c0_2] : memref<32x96xf32, #tpu.memory_space<vmem>>, vector<32x96xf32>
    %cst = arith.constant dense<0.000000e+00> : vector<16x96xf32>
    %2 = tpu.matmul %0, %1, %cst {dimension_numbers = #tpu.dot_dimension_numbers<[1], [0], [0], [1], [0, 0, 1, 1], [], []>} : vector<16x32xf32>, vector<32x96xf32>, vector<16x96xf32> -> vector<16x96xf32>
    %c0_3 = arith.constant 0 : index
    %c0_4 = arith.constant 0 : index
    %3 = vector.load %arg3[%c0_3, %c0_4] : memref<1x96xf32, #tpu.memory_space<vmem>>, vector<1x96xf32>
    %4 = vector.broadcast %3 : vector<1x96xf32> to vector<16x96xf32>
    %5 = arith.addf %2, %4 : vector<16x96xf32>
    %6 = vector.extract_strided_slice %5 {offsets = [0, 0], sizes = [16, 64], strides = [1, 1]} : vector<16x96xf32> to vector<16x64xf32>
    %7 = vector.extract_strided_slice %5 {offsets = [0, 64], sizes = [16, 32], strides = [1, 1]} : vector<16x96xf32> to vector<16x32xf32>
    %c0_5 = arith.constant 0 : index
    %c0_6 = arith.constant 0 : index
    %8 = vector.load %arg6[%c0_5, %c0_6] : memref<64x64xf32, #tpu.memory_space<vmem>>, vector<64x64xf32>
    %cst_7 = arith.constant dense<0.000000e+00> : vector<16x64xf32>
    %9 = tpu.matmul %6, %8, %cst_7 {dimension_numbers = #tpu.dot_dimension_numbers<[1], [0], [0], [1], [0, 0, 1, 1], [], []>} : vector<16x64xf32>, vector<64x64xf32>, vector<16x64xf32> -> vector<16x64xf32>
    %10 = arith.subf %6, %9 : vector<16x64xf32>
    %11 = arith.mulf %10, %10 : vector<16x64xf32>
    %cst_8 = arith.constant dense<0.000000e+00> : vector<16x64xf32>
    %12 = tpu.matmul %11, %8, %cst_8 {dimension_numbers = #tpu.dot_dimension_numbers<[1], [0], [0], [1], [0, 0, 1, 1], [], []>} : vector<16x64xf32>, vector<64x64xf32>, vector<16x64xf32> -> vector<16x64xf32>
    %cst_9 = arith.constant 9.99999974E-6 : f32
    %13 = vector.broadcast %cst_9 : f32 to vector<16x64xf32>
    %14 = arith.addf %12, %13 : vector<16x64xf32>
    %15 = math.rsqrt %14 : vector<16x64xf32>
    %16 = arith.mulf %10, %15 : vector<16x64xf32>
    %17 = vector.extract_strided_slice %16 {offsets = [0, 0], sizes = [16, 32], strides = [1, 1]} : vector<16x64xf32> to vector<16x32xf32>
    %cst_10 = arith.constant 0.353553385 : f32
    %18 = vector.broadcast %cst_10 : f32 to vector<16x32xf32>
    %19 = arith.mulf %17, %18 : vector<16x32xf32>
    %20 = vector.extract_strided_slice %16 {offsets = [0, 32], sizes = [16, 32], strides = [1, 1]} : vector<16x64xf32> to vector<16x32xf32>
    %c0_11 = arith.constant 0 : index
    %c0_12 = arith.constant 0 : index
    %21 = vector.load %arg8[%c0_11, %c0_12] : memref<64x32xf32, #tpu.memory_space<vmem>>, vector<64x32xf32>
    %22 = tpu.concatenate %20, %20, %20, %20 in 0 : vector<16x32xf32>, vector<16x32xf32>, vector<16x32xf32>, vector<16x32xf32> -> vector<64x32xf32>
    %23 = arith.mulf %22, %21 : vector<64x32xf32>
    %24 = tpu.concatenate %7, %7, %7, %7 in 0 : vector<16x32xf32>, vector<16x32xf32>, vector<16x32xf32>, vector<16x32xf32> -> vector<64x32xf32>
    %25 = arith.mulf %24, %21 : vector<64x32xf32>
    %cst_13 = arith.constant dense<0.000000e+00> : vector<16x64xf32>
    %26 = tpu.matmul %19, %23, %cst_13 {dimension_numbers = #tpu.dot_dimension_numbers<[1], [1], [0], [0], [0, 0, 1, 0], [], []>} : vector<16x32xf32>, vector<64x32xf32>, vector<16x64xf32> -> vector<16x64xf32>
    %c0_14 = arith.constant 0 : index
    %c0_15 = arith.constant 0 : index
    %27 = vector.load %arg7[%c0_14, %c0_15] : memref<16x64xf32, #tpu.memory_space<vmem>>, vector<16x64xf32>
    %28 = arith.addf %26, %27 : vector<16x64xf32>
    %29 = math.exp %28 : vector<16x64xf32>
    %cst_16 = arith.constant dense<0.000000e+00> : vector<16x32xf32>
    %30 = tpu.matmul %29, %25, %cst_16 {dimension_numbers = #tpu.dot_dimension_numbers<[1], [0], [0], [1], [0, 0, 1, 1], [], []>} : vector<16x64xf32>, vector<64x32xf32>, vector<16x32xf32> -> vector<16x32xf32>
    %cst_17 = arith.constant dense<0.000000e+00> : vector<16x32xf32>
    %31 = tpu.matmul %29, %21, %cst_17 {dimension_numbers = #tpu.dot_dimension_numbers<[1], [0], [0], [1], [0, 0, 1, 1], [], []>} : vector<16x64xf32>, vector<64x32xf32>, vector<16x32xf32> -> vector<16x32xf32>
    %32 = tpu.reciprocal %31 {approx = true} : vector<16x32xf32> -> vector<16x32xf32>
    %33 = arith.mulf %30, %32 : vector<16x32xf32>
    %c0_18 = arith.constant 0 : index
    %c0_19 = arith.constant 0 : index
    %34 = vector.load %arg4[%c0_18, %c0_19] : memref<32x32xf32, #tpu.memory_space<vmem>>, vector<32x32xf32>
    %cst_20 = arith.constant dense<0.000000e+00> : vector<16x32xf32>
    %35 = tpu.matmul %33, %34, %cst_20 {dimension_numbers = #tpu.dot_dimension_numbers<[1], [0], [0], [1], [0, 0, 1, 1], [], []>} : vector<16x32xf32>, vector<32x32xf32>, vector<16x32xf32> -> vector<16x32xf32>
    %c0_21 = arith.constant 0 : index
    %c0_22 = arith.constant 0 : index
    %36 = vector.load %arg5[%c0_21, %c0_22] : memref<1x32xf32, #tpu.memory_space<vmem>>, vector<1x32xf32>
    %37 = vector.broadcast %36 : vector<1x32xf32> to vector<16x32xf32>
    %38 = arith.addf %35, %37 : vector<16x32xf32>
    %c0_23 = arith.constant 0 : index
    %c0_24 = arith.constant 0 : index
    %39 = vector.load %arg9[%c0_23, %c0_24] : memref<16x32xf32, #tpu.memory_space<vmem>>, vector<16x32xf32>
    tpu.vector_store %arg9[%c0_23, %c0_24], %38 {strides = array<i32>} : memref<16x32xf32, #tpu.memory_space<vmem>>, vector<16x32xf32>,
    return
  }
  func.func @transform_0(%arg0: i32) -> (i32, i32) {
    %c0_i32 = arith.constant 0 : i32
    %c0_i32_0 = arith.constant 0 : i32
    %c0_i32_1 = arith.constant 0 : i32
    return %c0_i32, %c0_i32_0 : i32, i32
  }
  func.func @transform_1(%arg0: i32) -> (i32, i32) {
    %c0_i32 = arith.constant 0 : i32
    %c0_i32_0 = arith.constant 0 : i32
    %c0_i32_1 = arith.constant 0 : i32
    return %c0_i32, %c0_i32_0 : i32, i32
  }
  func.func @transform_2(%arg0: i32) -> (i32, i32) {
    %c0_i32 = arith.constant 0 : i32
    %c0_i32_0 = arith.constant 0 : i32
    %c0_i32_1 = arith.constant 0 : i32
    return %c0_i32, %c0_i32_0 : i32, i32
  }
  func.func @transform_3(%arg0: i32) -> (i32, i32) {
    %c0_i32 = arith.constant 0 : i32
    %c0_i32_0 = arith.constant 0 : i32
    %c0_i32_1 = arith.constant 0 : i32
    return %c0_i32, %c0_i32_0 : i32, i32
  }
  func.func @transform_4(%arg0: i32) -> (i32, i32) {
    %c0_i32 = arith.constant 0 : i32
    %c0_i32_0 = arith.constant 0 : i32
    %c0_i32_1 = arith.constant 0 : i32
    return %c0_i32, %c0_i32_0 : i32, i32
  }
  func.func @transform_5(%arg0: i32) -> (i32, i32) {
    %c0_i32 = arith.constant 0 : i32
    %c0_i32_0 = arith.constant 0 : i32
    %c0_i32_1 = arith.constant 0 : i32
    return %c0_i32, %c0_i32_0 : i32, i32
  }
  func.func @transform_6(%arg0: i32) -> (i32, i32) {
    %c0_i32 = arith.constant 0 : i32
    %c0_i32_0 = arith.constant 0 : i32
    %c0_i32_1 = arith.constant 0 : i32
    return %c0_i32, %c0_i32_0 : i32, i32
  }
  func.func @transform_7(%arg0: i32) -> (i32, i32) {
    %c0_i32 = arith.constant 0 : i32
    %c0_i32_0 = arith.constant 0 : i32
    %c0_i32_1 = arith.constant 0 : i32
    return %c0_i32, %c0_i32_0 : i32, i32
  }
  func.func @transform_8(%arg0: i32) -> (i32, i32) {
    %c0_i32 = arith.constant 0 : i32
    %c0_i32_0 = arith.constant 0 : i32
    %c0_i32_1 = arith.constant 0 : i32
    return %c0_i32, %c0_i32_0 : i32, i32
  }
}

</mosaic_0001>

<bundles_post_ra>
// kernel: mha_forward.1
= control target key start
LH: loop header
LB: loop body
LE: loop exit
PB: predicated region body
PF: predicated region fallthrough
CT: control target
= control target key end

     0   :  { %13 = vsyncpa [#allocation3], 0  ;;  %s1567_s0 = inlined_call_operand.vmem [shape: f32[16,32], index: 0, kind: input, shape index: {}]   ;;  %s1568_s1 = inlined_call_operand.vmem [shape: f32[32,96], index: 1, kind: input, shape index: {}]   ;;  %s1569_s2 = inlined_call_operand.vmem [shape: f32[1,96], index: 2, kind: input, shape index: {}]   ;;  %s1570_s3 = inlined_call_operand.hbm [shape: f32[32,32], index: 3, kind: input, shape index: {}]   ;;  %s1571_s4 = inlined_call_operand.vmem [shape: f32[1,32], index: 4, kind: input, shape index: {}]   ;;  %s1572_s5 = inlined_call_operand.vmem [shape: f32[64,64], index: 5, kind: input, shape index: {}]   ;;  %s1573_s6 = inlined_call_operand.hbm [shape: f32[16,64], index: 6, kind: input, shape index: {}]   ;;  %s1574_s7 = inlined_call_operand.vmem [shape: f32[64,32], index: 7, kind: input, shape index: {}]   ;;  %s1575_s8 = inlined_call_operand.hbm [shape: f32[16,32], index: 8, kind: output, shape index: {}]  }
   0x1   :  { %14 = vsyncpa [#allocation6], 0 }
   0x2   :  { %15 = vsyncpa [#allocation4], 0  ;;  %s1284_s27 = smov [#allocation2]   ;;  %s1212_s9 = scalar_lea.hbm %s1570_s3, 512 }
   0x3   :  { %s27_s28 = sshll.u32 %s1284_s27, 4  ;;  %p1213_p0 = scmp.ne.s32.totalorder %s1570_s3, %s1212_s9  ;;  %s28_s28 = int_to_ptr.vmem [resolvable:$true] %s27_s28 }
   0x4   :  { %p1216_p1 = scmp.lt.u32.totalorder %s1212_s9, %s1570_s3 }
   0x6   :  { %p1218_p2 = pnand %p1216_p1, %p1213_p0 }
   0x8   :  { %1221 = shalt.err (!%p1218_p2)
}
   0x9   :  { %s1222_s14 = scalar_lea.vmem %s28_s28, 512  ;;  %p1227_p4 = scmp.lt.s32.totalorder %s28_s28, %s28_s28 }
   0xa   :  { %p1223_p3 = scmp.ne.s32.totalorder %s28_s28, %s1222_s14  ;;  %p1228_p5 = scmp.lt.s32.totalorder %s1222_s14, %s1222_s14 }
   0xc   :  { %p1229_p6 = por %p1228_p5, %p1227_p4 }
   0xe   :  { %p1230_p7 = pnand %p1229_p6, %p1223_p3 }
  0x10   :  { %1233 = shalt.err (!%p1230_p7)
}
  0x11   :  { %s1285_s15 = smov 128   ;;  %s1286_s16 = smov 8  }
  0x12   :  { %33 = dma.hbm_to_vmem [thread:$0]  %s1570_s3, 512, %s28_s28, [#allocation3], %s1285_s15, %s1285_s15, %s1286_s16  }
  0x13   :  { %s1287_s19 = smov [#allocation5]   ;;  %s1234_s23 = scalar_lea.hbm %s1573_s6, 256 }
  0x14   :  { %s43_s20 = sshll.u32 %s1287_s19, 4  ;;  %p1235_p8 = scmp.ne.s32.totalorder %s1573_s6, %s1234_s23  ;;  %s44_s20 = int_to_ptr.vmem [resolvable:$true] %s43_s20 }
  0x15   :  { %p1238_p9 = scmp.lt.u32.totalorder %s1234_s23, %s1573_s6 }
  0x17   :  { %p1240_p10 = pnand %p1238_p9, %p1235_p8 }
  0x19   :  { %1243 = shalt.err (!%p1240_p10)
}
  0x1a   :  { %s1244_s29 = scalar_lea.vmem %s44_s20, 256  ;;  %p1249_p12 = scmp.lt.s32.totalorder %s44_s20, %s44_s20 }
  0x1b   :  { %p1245_p11 = scmp.ne.s32.totalorder %s44_s20, %s1244_s29  ;;  %p1250_p13 = scmp.lt.s32.totalorder %s1244_s29, %s1244_s29 }
  0x1d   :  { %p1251_p0 = por %p1250_p13, %p1249_p12 }
  0x1f   :  { %p1252_p1 = pnand %p1251_p0, %p1245_p11 }
  0x21   :  { %1255 = shalt.err (!%p1252_p1)
}
  0x22   :  { %49 = dma.hbm_to_vmem [thread:$0]  %s1573_s6, 256, %s44_s20, [#allocation6], %s1285_s15, %s1285_s15, %s1286_s16  }
  0x23   :  { %1278 = dma.done.wait [#allocation3], 512  }
  0x24   :  { %1279 = vsyncadd [#allocation3], 4294966784 }
  0x25   :  { %1280 = dma.done.wait [#allocation6], 256  }
  0x26   :  { %1281 = vsyncadd [#allocation6], 4294967040  ;;  %vm71_vm0 = vcmask 261120   ;;  %v60_v0 = vld [vmem:[%s1568_s1] sm:$0xff]  ;;  %v61_v1 = vld [vmem:[%s1568_s1 + $0x8] sm:$0xff]  ;;  %vm161_vm1 = vcmask 523264  }
  0x27   :  { %v62_v2 = vld [vmem:[%s1568_s1 + $0x10] sm:$0xff]  ;;  %v1048_v3 = vpack.c.bf16 %v61_v1, %v60_v0  ;;  %v63_v4 = vld [vmem:[%s1568_s1 + $0x18] sm:$0xff]  ;;  %v58_v5 = vld [vmem:[%s1567_s0] sm:$0xff]  ;;  %s1288_s17 = smov 32   ;;  %s1290_s3 = smov 64  }
  0x28   :  { %v1052_v6 = vpack.c.bf16 %v63_v4, %v62_v2  ;;  %939 = vmatprep.mubr.msk.f32.mxu0 %vm71_vm0, %v58_v5  ;;  %v153_v7 = vld [vmem:[%s1572_s5] sm:$0xff]  ;;  %v154_v8 = vld [vmem:[%s1572_s5 + $0x8] sm:$0xff]  ;;  %v155_v9 = vld [vmem:[%s1572_s5 + $0x10] sm:$0xff]  ;;  %s1291_s9 = smov [#allocation7]  }
  0x29   :  { %1049 = vmatprep.subr.bf16.mxu0 %v1048_v3  ;;  %v1056_v10 = vpack.c.bf16 %v154_v8, %v153_v7  ;;  %v156_v11 = vld [vmem:[%s1572_s5 + $0x18] sm:$0xff]  ;;  %v157_v13 = vld [vmem:[%s1572_s5 + $0x20] sm:$0xff]  ;;  %v158_v14 = vld [vmem:[%s1572_s5 + $0x28] sm:$0xff]  ;;  %s832_s10 = sshll.u32 %s1291_s9, 4  ;;  %s833_s10 = int_to_ptr.vmem [resolvable:$true] %s832_s10 }
  0x2a   :  { %1051 = vmatpush3.bf16.msra.mxu0 %v1048_v3  ;;  %v1060_v12 = vpack.c.bf16 %v156_v11, %v155_v9  ;;  %v1064_v15 = vpack.c.bf16 %v158_v14, %v157_v13  ;;  %v59_v16 = vld [vmem:[%s1567_s0 + $0x8] sm:$0xff]  ;;  %v159_v17 = vld [vmem:[%s1572_s5 + $0x30] sm:$0xff]  ;;  %v160_v18 = vld [vmem:[%s1572_s5 + $0x38] sm:$0xff]  ;;  %s1256_s11 = scalar_lea.vmem %s833_s10, 256  ;;  %p1261_p3 = scmp.lt.s32.totalorder %s833_s10, %s833_s10 }
  0x2b   :  { %1053 = vmatprep.subr.bf16.mxu0 %v1052_v6  ;;  %1057 = vmatprep.subr.bf16.mxu1 %v1056_v10  ;;  %v1068_v19 = vpack.c.bf16 %v160_v18, %v159_v17  ;;  %v845_v20 = vld [vmem:[%s1569_s2] ss:$0 sm:$0xff]  ;;  %v1425_v25 = vld [vmem:[%s1574_s7 + $0x10] sm:$0xff]  ;;  %v1437_v27 = vld [vmem:[%s1574_s7 + $0x18] sm:$0xff]  ;;  %p1257_p2 = scmp.ne.s32.totalorder %s833_s10, %s1256_s11  ;;  %p1262_p4 = scmp.lt.s32.totalorder %s1256_s11, %s1256_s11 }
  0x2c   :  { %1059 = vmatpush3.bf16.msra.mxu1 %v1056_v10  ;;  %v1430_v26 = vld [vmem:[%s1574_s7] sm:$0xff]  ;;  %354 = vrot.lane.b32.xlu1 %v1425_v25, %s1288_s17  ;;  %v1442_v28 = vld [vmem:[%s1574_s7 + $0x8] sm:$0xff]  ;;  %v1461_v31 = vld [vmem:[%s1574_s7 + $0x38] sm:$0xff] }
  0x2d   :  { %1061 = vmatprep.subr.bf16.mxu1 %v1060_v12  ;;  %350 = vrot.lane.b32.xlu0 %v1430_v26, %s1288_s17  ;;  %v1449_v29 = vld [vmem:[%s1574_s7 + $0x28] sm:$0xff]  ;;  %v1454_v30 = vld [vmem:[%s1574_s7 + $0x20] sm:$0xff]  ;;  %v1466_v32 = vld [vmem:[%s1574_s7 + $0x30] sm:$0xff]  ;;  %s1289_s7 = smov 96   ;;  %p1263_p5 = por %p1262_p4, %p1261_p3 }
  0x2e   :  { %1055 = vmatpush3.bf16.msra.mxu0 %v1052_v6  ;;  %vm1499_vm2 = vmpackc.low %vm71_vm0, %vm71_vm0 }
  0x2f   :  { %1073 = vmatprep.subr.bf16.mxu0 %v1056_v10  ;;  %p1264_p6 = pnand %p1263_p5, %p1257_p2 }
  0x30   :  { %1063 = vmatpush3.bf16.msra.mxu1 %v1060_v12  ;;  %356 = vrot.lane.b32.xlu1 %v1437_v27, %s1288_s17 }
  0x31   :  { %940 = vmatmul.mubr.msk.f32.vlgmr.msra.gmra.mrb[0].mxu0 %vm71_vm0, %v59_v16  ;;  %1065 = vmatprep.subr.bf16.mxu1 %v1064_v15 }
  0x32   :  { %1075 = vmatpush3.bf16.msra.mxu0 %v1056_v10  ;;  %352 = vrot.lane.b32.xlu0 %v1442_v28, %s1288_s17 }
  0x33   :  { %1077 = vmatprep.subr.bf16.mxu0 %v1060_v12 }
  0x34   :  { %1067 = vmatpush3.bf16.msra.mxu1 %v1064_v15  ;;  %360 = vrot.lane.b32.xlu1 %v1449_v29, %s1288_s17 }
  0x35   :  { %1069 = vmatprep.subr.bf16.mxu1 %v1068_v19 }
  0x36   :  { %1079 = vmatpush3.bf16.msra.mxu0 %v1060_v12  ;;  %358 = vrot.lane.b32.xlu0 %v1454_v30, %s1288_s17 }
  0x37   :  { %1081 = vmatprep.subr.bf16.mxu0 %v1064_v15 }
  0x38   :  { %1071 = vmatpush3.bf16.msra.mxu1 %v1068_v19  ;;  %364 = vrot.lane.b32.xlu1 %v1461_v31, %s1288_s17 }
  0x3a   :  { %1083 = vmatpush3.bf16.msra.mxu0 %v1064_v15  ;;  %362 = vrot.lane.b32.xlu0 %v1466_v32, %s1288_s17 }
  0x3b   :  { %1085 = vmatprep.subr.bf16.mxu0 %v1068_v19 }
  0x3e   :  { %1087 = vmatpush3.bf16.msra.mxu0 %v1068_v19 }
  0x9e   :  { %v355_v39 = vpop.permute.xlu1 %354 }
  0x9f   :  { %v351_v40 = vpop.permute.xlu0 %350 }
  0xa2   :  { %v357_v44 = vpop.permute.xlu1 %356 }
  0xa4   :  { %v353_v46 = vpop.permute.xlu0 %352 }
  0xa6   :  { %v361_v47 = vpop.permute.xlu1 %360 }
  0xa8   :  { %v359_v48 = vpop.permute.xlu0 %358 }
  0xaa   :  { %v365_v50 = vpop.permute.xlu1 %364 }
  0xac   :  { %v363_v53 = vpop.permute.xlu0 %362 }
 0x104   :  { %v941_v21 = vpop.f32.mrb[0].mxu0 }
 0x105   :  { %v144_v22 = vpop.f32.mrb[1].mxu0  ;;  %v1416_v24 = vadd.f32 %v941_v21, %v845_v20 }
 0x106   :  { %v1414_v23 = vadd.f32 %v845_v20, %v144_v22 }
 0x108   :  { %958 = vmatprep.mubr.msk.f32.mxu1 %vm161_vm1, %v1414_v23 }
 0x109   :  { %959 = vmatmul.mubr.msk.f32.vlgmr.msra.gmra.mrb[0].mxu1 %vm161_vm1, %v1416_v24 }
 0x1dc   :  { %v960_v33 = vpop.f32.mrb[0].mxu1 }
 0x1dd   :  { %v244_v34 = vsub.f32 %v1416_v24, %v960_v33  ;;  %v234_v35 = vpop.f32.mrb[1].mxu1 }
 0x1de   :  { %v243_v36 = vsub.f32 %v1414_v23, %v234_v35 }
 0x1df   :  { %v246_v38 = vmul.f32 %v244_v34, %v244_v34 }
 0x1e0   :  { %v245_v37 = vmul.f32 %v243_v36, %v243_v36 }
 0x1e2   :  { %977 = vmatprep.mubr.msk.f32.mxu0 %vm161_vm1, %v245_v37 }
 0x1e3   :  { %978 = vmatmul.mubr.msk.f32.vlgmr.msra.gmra.mrb[2].mxu0 %vm161_vm1, %v246_v38 }
 0x2b6   :  { %v979_v41 = vpop.f32.mrb[2].mxu0 }
 0x2b7   :  { %v325_v42 = vadd.f32 1e-05, %v979_v41  ;;  %v319_v43 = vpop.f32.mrb[3].mxu0 }
 0x2b8   :  { %v320_v45 = vadd.f32 1e-05, %v319_v43 }
 0x2b9   :  { %1200 = vrsqrt.f32 %v325_v42 }
 0x2ba   :  { %1202 = vrsqrt.f32 %v320_v45 }
 0x2c3   :  { %v1201_v49 = vpop.eup %1200 }
 0x2c4   :  { %v1203_v51 = vpop.eup %1202  ;;  %v1474_v52 = vmul.f32 %v1201_v49, %v244_v34 }
 0x2c5   :  { %v330_v54 = vmul.f32 %v1203_v51, %v243_v36 }
 0x2c6   :  { %v377_v55 = vmul.f32 %v357_v44, %v1474_v52  ;;  %v375_v56 = vmul.f32 %v353_v46, %v1474_v52  ;;  %v379_v57 = vmul.f32 %v361_v47, %v1474_v52  ;;  %v381_v58 = vmul.f32 %v365_v50, %v1474_v52 }
 0x2c7   :  { %v376_v59 = vmul.f32 %v355_v39, %v330_v54  ;;  %v374_v60 = vmul.f32 %v351_v40, %v330_v54  ;;  %v378_v61 = vmul.f32 %v359_v48, %v330_v54  ;;  %v380_v62 = vmul.f32 %v363_v53, %v330_v54 }
 0x2c8   :  { %v332_v63 = vmul.f32 0.35355338, %v330_v54  ;;  %v333_v51 = vmul.f32 0.35355338, %v1474_v52 }
 0x2c9   :  { %v1165_v0 = vpack.i.bf16 %v377_v55, %v376_v59  ;;  %v1160_v1 = vpack.i.bf16 %v375_v56, %v374_v60  ;;  %v1170_v2 = vpack.i.bf16 %v379_v57, %v378_v61  ;;  %v1175_v3 = vpack.i.bf16 %v381_v58, %v380_v62 }
 0x2ca   :  { %996 = vmatprep.mubr.msk.f32.mxu1 %vm71_vm0, %v332_v63 }
 0x2cb   :  { %1166 = vrot.lane.b32.xlu1 %v1165_v0, %s1289_s7  ;;  %1161 = vrot.lane.b32.xlu0 %v1160_v1, %s1289_s7 }
 0x2cf   :  { %1176 = vrot.lane.b32.xlu1 %v1175_v3, %s1289_s7  ;;  %1171 = vrot.lane.b32.xlu0 %v1170_v2, %s1289_s7  ;;  %v1128_v2 = vpack.c.bf16 %v1442_v28, %v1430_v26  ;;  %v415_v3 = vld [vmem:[#allocation5 + $0x8] sm:$0xff] }
 0x2d3   :  { %384 = vrot.lane.b32.xlu1 %v1442_v28, %s1290_s3  ;;  %382 = vrot.lane.b32.xlu0 %v1430_v26, %s1290_s3  ;;  %v1136_v26 = vpack.c.bf16 %v1449_v29, %v1454_v30  ;;  %v1140_v28 = vpack.c.bf16 %v1461_v31, %v1466_v32 }
 0x2d7   :  { %388 = vrot.lane.b32.xlu1 %v1437_v27, %s1290_s3  ;;  %386 = vrot.lane.b32.xlu0 %v1425_v25, %s1290_s3 }
 0x2db   :  { %392 = vrot.lane.b32.xlu1 %v1449_v29, %s1290_s3  ;;  %390 = vrot.lane.b32.xlu0 %v1454_v30, %s1290_s3 }
 0x2df   :  { %396 = vrot.lane.b32.xlu1 %v1461_v31, %s1290_s3  ;;  %394 = vrot.lane.b32.xlu0 %v1466_v32, %s1290_s3 }
 0x33d   :  { %v1167_v4 = vpop.permute.xlu1 %1166  ;;  %v1162_v5 = vpop.permute.xlu0 %1161 }
 0x33e   :  { %v1169_v6 = vunpack.i.h.bf16 %v1167_v4  ;;  %v1168_v7 = vunpack.i.l.bf16 %v1167_v4  ;;  %v1164_v8 = vunpack.i.h.bf16 %v1162_v5  ;;  %v1163_v9 = vunpack.i.l.bf16 %v1162_v5  ;;  %v414_v4 = vld [vmem:[#allocation5] sm:$0xff] }
 0x340   :  { %v1088_v11 = vpack.c.bf16 %v1164_v8, %v1163_v9  ;;  %v1094_v14 = vpack.c.bf16 %v1169_v6, %v1168_v7 }
 0x341   :  { %v1177_v12 = vpop.permute.xlu1 %1176  ;;  %v1172_v13 = vpop.permute.xlu0 %1171 }
 0x342   :  { %1090 = vmatprep.subr.msk.bf16.mxu1 %vm1499_vm2, %v1088_v11  ;;  %v1174_v17 = vunpack.i.h.bf16 %v1172_v13  ;;  %v1173_v18 = vunpack.i.l.bf16 %v1172_v13  ;;  %v1179_v40 = vunpack.i.h.bf16 %v1177_v12  ;;  %v1178_v41 = vunpack.i.l.bf16 %v1177_v12 }
 0x343   :  { %1093 = vmatpush3.bf16.xpose.msk.msra.mxu1 %vm1499_vm2, %v1088_v11  ;;  %v1132_v12 = vpack.c.bf16 %v1437_v27, %v1425_v25  ;;  %v733_v25 = vld [vmem:[#allocation2] sm:$0xff]  ;;  %v734_v27 = vld [vmem:[#allocation2 + $0x8] sm:$0xff] }
 0x344   :  { %1096 = vmatprep.subr.msk.bf16.mxu1 %vm1499_vm2, %v1094_v14  ;;  %v1100_v34 = vpack.c.bf16 %v1174_v17, %v1173_v18  ;;  %v1106_v47 = vpack.c.bf16 %v1179_v40, %v1178_v41 }
 0x345   :  { %v385_v15 = vpop.permute.xlu1 %384  ;;  %v383_v16 = vpop.permute.xlu0 %382 }
 0x346   :  { %v407_v19 = vmul.f32 %v385_v15, %v1416_v24  ;;  %v406_v20 = vmul.f32 %v383_v16, %v1414_v23  ;;  %v735_v15 = vld [vmem:[#allocation2 + $0x10] sm:$0xff]  ;;  %v736_v16 = vld [vmem:[#allocation2 + $0x18] sm:$0xff] }
 0x347   :  { %v1148_v17 = vpack.c.bf16 %v736_v16, %v735_v15 }
 0x348   :  { %v1180_v21 = vpack.i.bf16 %v407_v19, %v406_v20 }
 0x349   :  { %v389_v22 = vpop.permute.xlu1 %388  ;;  %v387_v33 = vpop.permute.xlu0 %386 }
 0x34a   :  { %v409_v35 = vmul.f32 %v389_v22, %v1416_v24  ;;  %v408_v36 = vmul.f32 %v387_v33, %v1414_v23  ;;  %1181 = vrot.lane.b32.xlu0 %v1180_v21, %s1290_s3  ;;  %v866_v22 = vld [vmem:[%s1571_s4] ss:$0 sm:$0xff] }
 0x34b   :  { %1099 = vmatpush3.bf16.xpose.msk.msra.mxu1 %vm1499_vm2, %v1094_v14  ;;  %v1144_v14 = vpack.c.bf16 %v734_v27, %v733_v25 }
 0x34c   :  { %v1185_v37 = vpack.i.bf16 %v409_v35, %v408_v36  ;;  %1102 = vmatprep.subr.msk.bf16.mxu1 %vm1499_vm2, %v1100_v34 }
 0x34d   :  { %v393_v38 = vpop.permute.xlu1 %392  ;;  %v391_v39 = vpop.permute.xlu0 %390 }
 0x34e   :  { %v411_v42 = vmul.f32 %v393_v38, %v1416_v24  ;;  %v410_v43 = vmul.f32 %v391_v39, %v1414_v23  ;;  %1186 = vrot.lane.b32.xlu1 %v1185_v37, %s1290_s3 }
 0x350   :  { %v1190_v44 = vpack.i.bf16 %v411_v42, %v410_v43 }
 0x351   :  { %v397_v45 = vpop.permute.xlu1 %396  ;;  %v395_v46 = vpop.permute.xlu0 %394 }
 0x352   :  { %v413_v48 = vmul.f32 %v397_v45, %v1416_v24  ;;  %v412_v49 = vmul.f32 %v395_v46, %v1414_v23  ;;  %1191 = vrot.lane.b32.xlu0 %v1190_v44, %s1290_s3 }
 0x353   :  { %1105 = vmatpush3.bf16.xpose.msk.msra.mxu1 %vm1499_vm2, %v1100_v34 }
 0x354   :  { %v1195_v50 = vpack.i.bf16 %v413_v48, %v412_v49  ;;  %1108 = vmatprep.subr.msk.bf16.mxu1 %vm1499_vm2, %v1106_v47 }
 0x356   :  { %1196 = vrot.lane.b32.xlu1 %v1195_v50, %s1290_s3 }
 0x35b   :  { %1111 = vmatpush3.bf16.xpose.msk.msra.mxu1 %vm1499_vm2, %v1106_v47 }
 0x35c   :  { %1145 = vmatprep.subr.bf16.mxu1 %v1144_v14 }
 0x362   :  { %997 = vmatmul.mubr.msk.f32.vlgmr.msra.gmra.mrb[2].mxu1 %vm71_vm0, %v333_v51 }
 0x363   :  { %1147 = vmatpush3.bf16.msra.mxu1 %v1144_v14 }
 0x364   :  { %1149 = vmatprep.subr.bf16.mxu1 %v1148_v17 }
 0x367   :  { %1151 = vmatpush3.bf16.msra.mxu1 %v1148_v17 }
 0x3bc   :  { %v1182_v24 = vpop.permute.xlu0 %1181 }
 0x3bd   :  { %v1184_v23 = vunpack.i.h.bf16 %v1182_v24  ;;  %v1183_v53 = vunpack.i.l.bf16 %v1182_v24 }
 0x3bf   :  { %v1112_v54 = vpack.c.bf16 %v1184_v23, %v1183_v53 }
 0x3c0   :  { %v1187_v55 = vpop.permute.xlu1 %1186 }
 0x3c1   :  { %v1189_v56 = vunpack.i.h.bf16 %v1187_v55  ;;  %v1188_v57 = vunpack.i.l.bf16 %v1187_v55  ;;  %1113 = vmatprep.subr.bf16.mxu0 %v1112_v54 }
 0x3c2   :  { %1115 = vmatpush3.bf16.msra.mxu0 %v1112_v54 }
 0x3c3   :  { %v1116_v58 = vpack.c.bf16 %v1189_v56, %v1188_v57 }
 0x3c4   :  { %v1192_v59 = vpop.permute.xlu0 %1191 }
 0x3c5   :  { %v1194_v60 = vunpack.i.h.bf16 %v1192_v59  ;;  %v1193_v61 = vunpack.i.l.bf16 %v1192_v59  ;;  %1117 = vmatprep.subr.bf16.mxu0 %v1116_v58 }
 0x3c6   :  { %1119 = vmatpush3.bf16.msra.mxu0 %v1116_v58 }
 0x3c7   :  { %v1120_v62 = vpack.c.bf16 %v1194_v60, %v1193_v61 }
 0x3c8   :  { %v1197_v63 = vpop.permute.xlu1 %1196 }
 0x3c9   :  { %v1199_v52 = vunpack.i.h.bf16 %v1197_v63  ;;  %v1198_v0 = vunpack.i.l.bf16 %v1197_v63  ;;  %1121 = vmatprep.subr.bf16.mxu0 %v1120_v62 }
 0x3ca   :  { %1123 = vmatpush3.bf16.msra.mxu0 %v1120_v62 }
 0x3cb   :  { %v1124_v1 = vpack.c.bf16 %v1199_v52, %v1198_v0 }
 0x3cd   :  { %1125 = vmatprep.subr.bf16.mxu0 %v1124_v1 }
 0x3ce   :  { %1127 = vmatpush3.bf16.msra.mxu0 %v1124_v1 }
 0x3cf   :  { %1129 = vmatprep.subr.bf16.mxu0 %v1128_v2 }
 0x435   :  { %v998_v5 = vpop.f32.mrb[2].mxu1 }
 0x436   :  { %v534_v6 = vadd.f32 %v998_v5, %v415_v3  ;;  %v528_v7 = vpop.f32.mrb[3].mxu1 }
 0x437   :  { %v529_v8 = vadd.f32 %v528_v7, %v414_v4 }
 0x438   :  { %v539_v9 = vmul.f32 1.442695, %v534_v6 }
 0x439   :  { %v537_v10 = vmul.f32 1.442695, %v529_v8 }
 0x43b   :  { %1204 = vpow2.f32 %v537_v10 }
 0x43c   :  { %1206 = vpow2.f32 %v539_v9 }
 0x445   :  { %v1205_v11 = vpop.eup %1204 }
 0x446   :  { %v1207_v13 = vpop.eup %1206  ;;  %1015 = vmatprep.mubr.msk.f32.mxu0 %vm161_vm1, %v1205_v11 }
 0x447   :  { %1016 = vmatmul.mubr.msk.f32.vlgmr.msra.gmra.mrb[4].mxu0 %vm161_vm1, %v1207_v13 }
 0x448   :  { %1131 = vmatpush3.bf16.msra.mxu0 %v1128_v2  ;;  %1034 = vmatprep.mubr.msk.f32.mxu0 %vm161_vm1, %v1205_v11 }
 0x449   :  { %1133 = vmatprep.subr.bf16.mxu0 %v1132_v12 }
 0x44c   :  { %1135 = vmatpush3.bf16.msra.mxu0 %v1132_v12 }
 0x44d   :  { %1137 = vmatprep.subr.bf16.mxu0 %v1136_v26 }
 0x450   :  { %1139 = vmatpush3.bf16.msra.mxu0 %v1136_v26 }
 0x451   :  { %1141 = vmatprep.subr.bf16.mxu0 %v1140_v28 }
 0x454   :  { %1143 = vmatpush3.bf16.msra.mxu0 %v1140_v28 }
 0x457   :  { %1035 = vmatmul.mubr.msk.f32.vlgmr.msra.gmra.mrb[6].mxu0 %vm161_vm1, %v1207_v13 }
 0x51a   :  { %v1017_v29 = vpop.f32.mrb[4].mxu0 }
 0x51b   :  { %v645_v30 = vpop.f32.mrb[5].mxu0 }
 0x52a   :  { %v1036_v18 = vpop.f32.mrb[6].mxu0 }
 0x52b   :  { %1208 = vrcp.f32 %v1036_v18  ;;  %v720_v31 = vpop.f32.mrb[7].mxu0 }
 0x52c   :  { %1210 = vrcp.f32 %v720_v31 }
 0x535   :  { %v1209_v32 = vpop.eup %1208 }
 0x536   :  { %v1211_v19 = vpop.eup %1210  ;;  %v732_v20 = vmul.f32 %v1209_v32, %v1017_v29 }
 0x537   :  { %v731_v21 = vmul.f32 %v1211_v19, %v645_v30 }
 0x539   :  { %1045 = vmatprep.mubr.msk.f32.mxu1 %vm71_vm0, %v731_v21 }
 0x53a   :  { %1046 = vmatmul.mubr.msk.f32.vlgmr.msra.gmra.mrb[4].mxu1 %vm71_vm0, %v732_v20 }
 0x60d   :  { %v1047_v33 = vpop.f32.mrb[4].mxu1 }
 0x60e   :  { %v822_v34 = vadd.f32 %v1047_v33, %v866_v22  ;;  %v816_v35 = vpop.f32.mrb[5].mxu1 }
 0x60f   :  { %v817_v36 = vadd.f32 %v866_v22, %v816_v35 }
 0x610   :  { %826 = vst.msk [vmem:[#allocation7 + $0x8] sm:$0xff] %vm71_vm0, %v822_v34 }
 0x611   :  { %825 = vst.msk [vmem:[#allocation7] sm:$0xff] %vm71_vm0, %v817_v36 }
 0x612   :  { %1267 = shalt.err (!%p1264_p6)
}
 0x613   :  { %s1268_s0 = scalar_lea.hbm %s1575_s8, 256 }
 0x614   :  { %p1269_p7 = scmp.ne.s32.totalorder %s1575_s8, %s1268_s0  ;;  %p1272_p8 = scmp.lt.u32.totalorder %s1268_s0, %s1575_s8 }
 0x616   :  { %p1274_p9 = pnand %p1272_p8, %p1269_p7 }
 0x618   :  { %1277 = shalt.err (!%p1274_p9)
}
 0x619   :  { %838 = dma.vmem_to_hbm [thread:$0]  %s833_s10, 256, %s1575_s8, [#allocation4], %s1285_s15, %s1285_s15, %s1286_s16  }
 0x61a   :  { %1282 = dma.done.wait [#allocation4], 256  }
 0x61b   :  { %1283 = vsyncadd [#allocation4], 4294967040 }
 0x61c   :  { %842 = vsyncpa [#allocation3], 1 }
 0x61d   :  { %843 = vsyncpa [#allocation6], 1 }
 0x61e   :  { %844 = vsyncpa [#allocation4], 1 }

</bundles_post_ra>
